<compile_context>
chip_gen: v5e
topology: v5e:2x2
jax: 0.10.0
libtpu: 0.0.40
codegen_flags: <defaults>
</compile_context>

<pallas_src>
import numpy as np
import jax
import jax.numpy as jnp
from jax.experimental import pallas as pl
from jax.experimental.pallas import tpu as pltpu

CLIP_MEAN = (0.48145466, 0.4578275, 0.40821073)
CLIP_STD = (0.26862954, 0.26130258, 0.27577711)


# ---------------------------------------------------------------------------
# Host-side glue: bicubic interpolation matrices (PyTorch bicubic, a=-0.75,
# align_corners=False) with the CenterCrop window folded in.
# ---------------------------------------------------------------------------
def _cubic(t, a=-0.75):
    t = np.abs(t)
    return np.where(
        t <= 1.0,
        (a + 2.0) * t**3 - (a + 3.0) * t**2 + 1.0,
        np.where(t < 2.0, a * t**3 - 5.0 * a * t**2 + 8.0 * a * t - 4.0 * a, 0.0),
    )


def _bicubic_matrix(in_size, out_size):
    scale = in_size / out_size
    m = np.zeros((out_size, in_size), dtype=np.float64)
    for i in range(out_size):
        x = (i + 0.5) * scale - 0.5
        x0 = int(np.floor(x))
        for k in range(-1, 3):
            idx = x0 + k
            w = float(_cubic(np.array(x - idx)))
            idx_c = min(max(idx, 0), in_size - 1)
            m[i, idx_c] += w
    return m.astype(np.float32)


def _resized_output_size(h, w, size):
    # torchvision Resize([size]): shorter side -> size, keep aspect ratio
    short, long = (w, h) if w <= h else (h, w)
    new_short, new_long = size, int(size * long / short)
    new_w, new_h = (new_short, new_long) if w <= h else (new_long, new_short)
    return new_h, new_w


def _build_interp_matrices(h, w, image_size):
    """Returns (Mh (S,H), MwT (W,S)) as float32 numpy, with CenterCrop folded in."""
    new_h, new_w = _resized_output_size(h, w, image_size)
    mh_full = _bicubic_matrix(h, new_h)   # (new_h, H)
    mw_full = _bicubic_matrix(w, new_w)   # (new_w, W)
    top = int(round((new_h - image_size) / 2.0))
    left = int(round((new_w - image_size) / 2.0))
    mh = mh_full[top:top + image_size, :]                               # (S, H)
    mwt = np.ascontiguousarray(mw_full[left:left + image_size, :].T)    # (W, S)
    return mh, mwt


def _split_bf16(m_np):
    """Dekker split: m ~= hi + lo with hi, lo in bf16 (keeps ~f32 accuracy on the MXU)."""
    m = jnp.asarray(m_np, jnp.float32)
    hi = m.astype(jnp.bfloat16)
    lo = (m - hi.astype(jnp.float32)).astype(jnp.bfloat16)
    return hi, lo


# ---------------------------------------------------------------------------
# Pallas kernel: one image (all channels) per grid step.
# ---------------------------------------------------------------------------
def _make_kernel(num_channels, hp, scale, bias, out_dtype):
    """scale/bias are per-channel python floats (compile-time constants)."""

    def kernel(mh_hi_ref, mh_lo_ref, mwt_hi_ref, mwt_lo_ref, x_ref, o_ref):
        # uint8 -> f32 (supported cast) -> bf16 (exact for 0..255). Channels were folded
        # into rows on the host, so one (C*Hp, W) operand feeds a single MXU call.
        xb = x_ref[0].astype(jnp.float32).astype(jnp.bfloat16)          # (C*Hp, W)

        # Stage 1 (dominant): contract W for all channels at once.
        # Split-bf16 matrix -> 2 bf16 dots, f32 accumulate (~f32 accurate).
        t = jnp.dot(xb, mwt_hi_ref[...], preferred_element_type=jnp.float32)
        t = t + jnp.dot(xb, mwt_lo_ref[...], preferred_element_type=jnp.float32)  # (C*Hp, S)

        mh_hi = mh_hi_ref[...]
        mh_lo = mh_lo_ref[...]
        for ch in range(num_channels):
            tc = t[ch * hp:(ch + 1) * hp, :]                             # (Hp, S) f32
            tc_hi = tc.astype(jnp.bfloat16)
            tc_lo = (tc - tc_hi.astype(jnp.float32)).astype(jnp.bfloat16)
            # Stage 2: contract Hp. hi*hi + hi*lo + lo*hi (lo*lo negligible).
            res = jnp.dot(mh_hi, tc_hi, preferred_element_type=jnp.float32)
            res = res + jnp.dot(mh_hi, tc_lo, preferred_element_type=jnp.float32)
            res = res + jnp.dot(mh_lo, tc_hi, preferred_element_type=jnp.float32)
            # torchvision Resize on a uint8 tensor rounds/clamps back to uint8
            res = jnp.clip(jnp.round(res), 0.0, 255.0)
            # ConvertImageDtype(float) + Normalize fused: x/(255*std) - mean/std
            o_ref[0, ch] = (res * scale[ch] - bias[ch]).astype(out_dtype)

    return kernel


def clip_transform(x_u8, image_size, out_dtype=jnp.float32):
    """x_u8: (N, C, H, W) uint8 image batch (NCHW). Returns (N, C, S, S) out_dtype."""
    n, c, h, w = x_u8.shape
    assert c == len(CLIP_MEAN), "Normalize is defined for 3 channels"
    s = image_size

    mh_np, mwt_np = _build_interp_matrices(h, w, s)      # (S, H), (W, S) f32

    # Pad H to a multiple of 8 (sublane alignment for the per-channel row slices of the
    # stage-1 result). Padded image rows are zero and the matching Mh columns are zero,
    # so the result is unchanged. Real images (H % 8 == 0) skip this entirely.
    hp = ((h + 7) // 8) * 8
    if hp != h:
        mh_np = np.pad(mh_np, ((0, 0), (0, hp - h)))
        x_u8 = jnp.pad(x_u8, ((0, 0), (0, 0), (0, hp - h), (0, 0)))

    mh_hi, mh_lo = _split_bf16(mh_np)                    # (S, Hp) bf16 x2
    mwt_hi, mwt_lo = _split_bf16(mwt_np)                 # (W, S)  bf16 x2

    # Fold channels into rows (free, contiguous reshape) -> one batched first contraction.
    x_rows = x_u8.reshape(n, c * hp, w)

    # Fold ConvertImageDtype + Normalize into one scale/bias per channel (compile-time).
    scale = tuple(float(1.0 / (255.0 * sd)) for sd in CLIP_STD)
    bias = tuple(float(m / sd) for m, sd in zip(CLIP_MEAN, CLIP_STD))

    kernel = _make_kernel(c, hp, scale, bias, out_dtype)

    # Generation-aware VMEM budget.
    try:
        physical_vmem = int(pltpu.get_tpu_info().vmem_capacity_bytes)
    except Exception:
        physical_vmem = 64 * 2**20        # conservative fallback (v7x per-core VMEM)

    out_bytes = jnp.dtype(out_dtype).itemsize
    img_block = c * hp * w                # uint8 bytes per image block
    out_block = c * s * s * out_bytes

    # Deeper input pipelining only where VMEM is plentiful (v5e/v6e, 128 MiB) and the
    # frame is big enough that the u8 image DMA can be the exposed cost.
    n_img_buffers = 2
    image_spec = pl.BlockSpec((1, c * hp, w), lambda i: (i, 0, 0))
    if physical_vmem >= 96 * 2**20 and img_block >= 2 * 2**20:
        try:
            image_spec = pl.BlockSpec((1, c * hp, w), lambda i: (i, 0, 0),
                                      pipeline_mode=pl.Buffered(3))
            n_img_buffers = 3
        except Exception:
            pass  # fall back to default double buffering

    needed = (n_img_buffers * img_block                 # pipelined u8 input blocks
              + 2 * out_block                           # double-buffered output blocks
              + 2 * 2 * (s * hp + w * s)                # bf16 hi/lo interp matrices
              + c * hp * w * (4 + 2)                    # f32 + bf16 casts of the image
              + c * hp * s * 4                          # stage-1 result (C*Hp, S) f32
              + 2 * hp * s * 2 + 3 * s * s * 4)         # per-channel split / epilogue temps
    vmem_limit = int(min(0.85 * physical_vmem, max(1.25 * needed, 32 * 2**20)))

    return pl.pallas_call(
        kernel,
        out_shape=jax.ShapeDtypeStruct((n, c, s, s), out_dtype),
        grid=(n,),
        in_specs=[
            pl.BlockSpec((s, hp), lambda i: (0, 0)),    # Mh hi  (shared, stays resident)
            pl.BlockSpec((s, hp), lambda i: (0, 0)),    # Mh lo
            pl.BlockSpec((w, s), lambda i: (0, 0)),     # MwT hi
            pl.BlockSpec((w, s), lambda i: (0, 0)),     # MwT lo
            image_spec,                                 # one uint8 image (channels folded)
        ],
        out_specs=pl.BlockSpec((1, c, s, s), lambda i: (i, 0, 0, 0)),
        compiler_params=pltpu.CompilerParams(
            dimension_semantics=("parallel",),
            vmem_limit_bytes=vmem_limit),
    )(mh_hi, mh_lo, mwt_hi, mwt_lo, x_rows)


# ---------------------------------------------------------------------------
# Pure-JAX reference (for a numerical sanity check in __main__).
# ---------------------------------------------------------------------------
def clip_transform_ref(x_u8, image_size):
    n, c, h, w = x_u8.shape
    s = image_size
    mh_np, mwt_np = _build_interp_matrices(h, w, s)
    mh = jnp.asarray(mh_np)        # (S, H)
    mwt = jnp.asarray(mwt_np)      # (W, S)
    img = x_u8.astype(jnp.float32)
    t = jnp.einsum('nchw,ws->nchs', img, mwt, precision=jax.lax.Precision.HIGHEST)
    r = jnp.einsum('sh,nchj->ncsj', mh, t, precision=jax.lax.Precision.HIGHEST)
    r = jnp.clip(jnp.round(r), 0.0, 255.0) / 255.0
    mean = jnp.asarray(CLIP_MEAN, jnp.float32).reshape(1, c, 1, 1)
    std = jnp.asarray(CLIP_STD, jnp.float32).reshape(1, c, 1, 1)
    return (r - mean) / std


if __name__ == "__main__":
    key = jax.random.PRNGKey(0)
    N, C, H, W = 2, 3, 20, 20          # square input -> resize to 16x16, crop is a no-op
    IMAGE_SIZE = 16

    x = jax.random.randint(key, (N, C, H, W), 0, 256, dtype=jnp.int32).astype(jnp.uint8)

    out = clip_transform(x, IMAGE_SIZE)
    out = jax.block_until_ready(out)

    assert out.shape == (N, C, IMAGE_SIZE, IMAGE_SIZE)
    assert out.dtype == jnp.float32
    assert bool(jnp.all(jnp.isfinite(out)))

    # Numerical sanity check vs. pure-JAX f32 reference (tolerance allows at most the
    # occasional +/-1 uint8-level flip from the split-bf16 MXU path: 1/255/std ~ 0.015).
    ref = jax.block_until_ready(clip_transform_ref(x, IMAGE_SIZE))
    max_err = float(jnp.max(jnp.abs(out - ref)))
    assert max_err < 0.06, f"max abs err vs reference: {max_err}"

    print("KERNEL_OK")
</pallas_src>

<mosaic_0001>
module attributes {stable_mosaic.version = 11 : i64} {
  func.func @kernel(%arg0: i32, %arg1: memref<16x24xbf16, #tpu.memory_space<vmem>>, %arg2: memref<16x24xbf16, #tpu.memory_space<vmem>>, %arg3: memref<20x16xbf16, #tpu.memory_space<vmem>>, %arg4: memref<20x16xbf16, #tpu.memory_space<vmem>>, %arg5: memref<1x72x20xi8, #tpu.memory_space<vmem>>, %arg6: memref<1x3x16x16xf32, #tpu.memory_space<vmem>>) attributes {dimension_semantics = [#tpu.dimension_semantics<parallel>], iteration_bounds = array<i64: 2>, scalar_prefetch = 0 : i64, scratch_operands = 0 : i64, tpu.core_type = #tpu.core_type<tc>, window_params = [{pipeline_mode = #tpu.pipeline_mode<synchronous>, transform_indices = @transform_0, window_bounds = array<i64: 16, 24>}, {pipeline_mode = #tpu.pipeline_mode<synchronous>, transform_indices = @transform_1, window_bounds = array<i64: 16, 24>}, {pipeline_mode = #tpu.pipeline_mode<synchronous>, transform_indices = @transform_2, window_bounds = array<i64: 20, 16>}, {pipeline_mode = #tpu.pipeline_mode<synchronous>, transform_indices = @transform_3, window_bounds = array<i64: 20, 16>}, {transform_indices = @transform_4, window_bounds = array<i64: 1, 72, 20>}, {transform_indices = @transform_5, window_bounds = array<i64: 1, 3, 16, 16>}]} {
    %c0 = arith.constant 0 : index
    %c0_0 = arith.constant 0 : index
    %c0_1 = arith.constant 0 : index
    %0 = vector.load %arg5[%c0, %c0_0, %c0_1] : memref<1x72x20xi8, #tpu.memory_space<vmem>>, vector<1x72x20xi8>
    %1 = vector.shape_cast %0 : vector<1x72x20xi8> to vector<72x20xi8>
    %2 = arith.uitofp %1 : vector<72x20xi8> to vector<72x20xf32>
    %3 = arith.truncf %2 : vector<72x20xf32> to vector<72x20xbf16>
    %c0_2 = arith.constant 0 : index
    %c0_3 = arith.constant 0 : index
    %4 = vector.load %arg3[%c0_2, %c0_3] : memref<20x16xbf16, #tpu.memory_space<vmem>>, vector<20x16xbf16>
    %cst = arith.constant dense<0.000000e+00> : vector<72x16xf32>
    %5 = tpu.matmul %3, %4, %cst {dimension_numbers = #tpu.dot_dimension_numbers<[1], [0], [0], [1], [0, 0, 1, 1], [], []>} : vector<72x20xbf16>, vector<20x16xbf16>, vector<72x16xf32> -> vector<72x16xf32>
    %c0_4 = arith.constant 0 : index
    %c0_5 = arith.constant 0 : index
    %6 = vector.load %arg4[%c0_4, %c0_5] : memref<20x16xbf16, #tpu.memory_space<vmem>>, vector<20x16xbf16>
    %cst_6 = arith.constant dense<0.000000e+00> : vector<72x16xf32>
    %7 = tpu.matmul %3, %6, %cst_6 {dimension_numbers = #tpu.dot_dimension_numbers<[1], [0], [0], [1], [0, 0, 1, 1], [], []>} : vector<72x20xbf16>, vector<20x16xbf16>, vector<72x16xf32> -> vector<72x16xf32>
    %8 = arith.addf %5, %7 : vector<72x16xf32>
    %c0_7 = arith.constant 0 : index
    %c0_8 = arith.constant 0 : index
    %9 = vector.load %arg1[%c0_7, %c0_8] : memref<16x24xbf16, #tpu.memory_space<vmem>>, vector<16x24xbf16>
    %c0_9 = arith.constant 0 : index
    %c0_10 = arith.constant 0 : index
    %10 = vector.load %arg2[%c0_9, %c0_10] : memref<16x24xbf16, #tpu.memory_space<vmem>>, vector<16x24xbf16>
    %11 = vector.extract_strided_slice %8 {offsets = [0, 0], sizes = [24, 16], strides = [1, 1]} : vector<72x16xf32> to vector<24x16xf32>
    %12 = arith.truncf %11 : vector<24x16xf32> to vector<24x16xbf16>
    %13 = arith.extf %12 : vector<24x16xbf16> to vector<24x16xf32>
    %14 = arith.subf %11, %13 : vector<24x16xf32>
    %15 = arith.truncf %14 : vector<24x16xf32> to vector<24x16xbf16>
    %cst_11 = arith.constant dense<0.000000e+00> : vector<16x16xf32>
    %16 = tpu.matmul %9, %12, %cst_11 {dimension_numbers = #tpu.dot_dimension_numbers<[1], [0], [0], [1], [0, 0, 1, 1], [], []>} : vector<16x24xbf16>, vector<24x16xbf16>, vector<16x16xf32> -> vector<16x16xf32>
    %cst_12 = arith.constant dense<0.000000e+00> : vector<16x16xf32>
    %17 = tpu.matmul %9, %15, %cst_12 {dimension_numbers = #tpu.dot_dimension_numbers<[1], [0], [0], [1], [0, 0, 1, 1], [], []>} : vector<16x24xbf16>, vector<24x16xbf16>, vector<16x16xf32> -> vector<16x16xf32>
    %18 = arith.addf %16, %17 : vector<16x16xf32>
    %cst_13 = arith.constant dense<0.000000e+00> : vector<16x16xf32>
    %19 = tpu.matmul %10, %12, %cst_13 {dimension_numbers = #tpu.dot_dimension_numbers<[1], [0], [0], [1], [0, 0, 1, 1], [], []>} : vector<16x24xbf16>, vector<24x16xbf16>, vector<16x16xf32> -> vector<16x16xf32>
    %20 = arith.addf %18, %19 : vector<16x16xf32>
    %21 = math.roundeven %20 : vector<16x16xf32>
    %cst_14 = arith.constant 0.000000e+00 : f32
    %cst_15 = arith.constant 2.550000e+02 : f32
    %22 = vector.broadcast %cst_14 : f32 to vector<16x16xf32>
    %23 = arith.maximumf %22, %21 : vector<16x16xf32>
    %24 = vector.broadcast %cst_15 : f32 to vector<16x16xf32>
    %25 = arith.minimumf %24, %23 : vector<16x16xf32>
    %cst_16 = arith.constant 0.0145984264 : f32
    %26 = vector.broadcast %cst_16 : f32 to vector<16x16xf32>
    %27 = arith.mulf %25, %26 : vector<16x16xf32>
    %cst_17 = arith.constant 1.79226255 : f32
    %28 = vector.broadcast %cst_17 : f32 to vector<16x16xf32>
    %29 = arith.subf %27, %28 : vector<16x16xf32>
    %c0_18 = arith.constant 0 : index
    %c0_19 = arith.constant 0 : index
    %c0_20 = arith.constant 0 : index
    %c0_21 = arith.constant 0 : index
    %30 = vector.load %arg6[%c0_18, %c0_19, %c0_20, %c0_21] : memref<1x3x16x16xf32, #tpu.memory_space<vmem>>, vector<1x1x16x16xf32>
    %31 = vector.shape_cast %30 : vector<1x1x16x16xf32> to vector<16x16xf32>
    %32 = vector.shape_cast %29 : vector<16x16xf32> to vector<1x1x16x16xf32>
    tpu.vector_store %arg6[%c0_18, %c0_19, %c0_20, %c0_21], %32 {strides = array<i32>} : memref<1x3x16x16xf32, #tpu.memory_space<vmem>>, vector<1x1x16x16xf32>,
    %33 = vector.extract_strided_slice %8 {offsets = [24, 0], sizes = [24, 16], strides = [1, 1]} : vector<72x16xf32> to vector<24x16xf32>
    %34 = arith.truncf %33 : vector<24x16xf32> to vector<24x16xbf16>
    %35 = arith.extf %34 : vector<24x16xbf16> to vector<24x16xf32>
    %36 = arith.subf %33, %35 : vector<24x16xf32>
    %37 = arith.truncf %36 : vector<24x16xf32> to vector<24x16xbf16>
    %cst_22 = arith.constant dense<0.000000e+00> : vector<16x16xf32>
    %38 = tpu.matmul %9, %34, %cst_22 {dimension_numbers = #tpu.dot_dimension_numbers<[1], [0], [0], [1], [0, 0, 1, 1], [], []>} : vector<16x24xbf16>, vector<24x16xbf16>, vector<16x16xf32> -> vector<16x16xf32>
    %cst_23 = arith.constant dense<0.000000e+00> : vector<16x16xf32>
    %39 = tpu.matmul %9, %37, %cst_23 {dimension_numbers = #tpu.dot_dimension_numbers<[1], [0], [0], [1], [0, 0, 1, 1], [], []>} : vector<16x24xbf16>, vector<24x16xbf16>, vector<16x16xf32> -> vector<16x16xf32>
    %40 = arith.addf %38, %39 : vector<16x16xf32>
    %cst_24 = arith.constant dense<0.000000e+00> : vector<16x16xf32>
    %41 = tpu.matmul %10, %34, %cst_24 {dimension_numbers = #tpu.dot_dimension_numbers<[1], [0], [0], [1], [0, 0, 1, 1], [], []>} : vector<16x24xbf16>, vector<24x16xbf16>, vector<16x16xf32> -> vector<16x16xf32>
    %42 = arith.addf %40, %41 : vector<16x16xf32>
    %43 = math.roundeven %42 : vector<16x16xf32>
    %cst_25 = arith.constant 0.000000e+00 : f32
    %cst_26 = arith.constant 2.550000e+02 : f32
    %44 = vector.broadcast %cst_25 : f32 to vector<16x16xf32>
    %45 = arith.maximumf %44, %43 : vector<16x16xf32>
    %46 = vector.broadcast %cst_26 : f32 to vector<16x16xf32>
    %47 = arith.minimumf %46, %45 : vector<16x16xf32>
    %cst_27 = arith.constant 0.0150077688 : f32
    %48 = vector.broadcast %cst_27 : f32 to vector<16x16xf32>
    %49 = arith.mulf %47, %48 : vector<16x16xf32>
    %cst_28 = arith.constant 1.75209713 : f32
    %50 = vector.broadcast %cst_28 : f32 to vector<16x16xf32>
    %51 = arith.subf %49, %50 : vector<16x16xf32>
    %c0_29 = arith.constant 0 : index
    %c1 = arith.constant 1 : index
    %c0_30 = arith.constant 0 : index
    %c0_31 = arith.constant 0 : index
    %52 = vector.load %arg6[%c0_29, %c1, %c0_30, %c0_31] : memref<1x3x16x16xf32, #tpu.memory_space<vmem>>, vector<1x1x16x16xf32>
    %53 = vector.shape_cast %52 : vector<1x1x16x16xf32> to vector<16x16xf32>
    %54 = vector.shape_cast %51 : vector<16x16xf32> to vector<1x1x16x16xf32>
    tpu.vector_store %arg6[%c0_29, %c1, %c0_30, %c0_31], %54 {strides = array<i32>} : memref<1x3x16x16xf32, #tpu.memory_space<vmem>>, vector<1x1x16x16xf32>,
    %55 = vector.extract_strided_slice %8 {offsets = [48, 0], sizes = [24, 16], strides = [1, 1]} : vector<72x16xf32> to vector<24x16xf32>
    %56 = arith.truncf %55 : vector<24x16xf32> to vector<24x16xbf16>
    %57 = arith.extf %56 : vector<24x16xbf16> to vector<24x16xf32>
    %58 = arith.subf %55, %57 : vector<24x16xf32>
    %59 = arith.truncf %58 : vector<24x16xf32> to vector<24x16xbf16>
    %cst_32 = arith.constant dense<0.000000e+00> : vector<16x16xf32>
    %60 = tpu.matmul %9, %56, %cst_32 {dimension_numbers = #tpu.dot_dimension_numbers<[1], [0], [0], [1], [0, 0, 1, 1], [], []>} : vector<16x24xbf16>, vector<24x16xbf16>, vector<16x16xf32> -> vector<16x16xf32>
    %cst_33 = arith.constant dense<0.000000e+00> : vector<16x16xf32>
    %61 = tpu.matmul %9, %59, %cst_33 {dimension_numbers = #tpu.dot_dimension_numbers<[1], [0], [0], [1], [0, 0, 1, 1], [], []>} : vector<16x24xbf16>, vector<24x16xbf16>, vector<16x16xf32> -> vector<16x16xf32>
    %62 = arith.addf %60, %61 : vector<16x16xf32>
    %cst_34 = arith.constant dense<0.000000e+00> : vector<16x16xf32>
    %63 = tpu.matmul %10, %56, %cst_34 {dimension_numbers = #tpu.dot_dimension_numbers<[1], [0], [0], [1], [0, 0, 1, 1], [], []>} : vector<16x24xbf16>, vector<24x16xbf16>, vector<16x16xf32> -> vector<16x16xf32>
    %64 = arith.addf %62, %63 : vector<16x16xf32>
    %65 = math.roundeven %64 : vector<16x16xf32>
    %cst_35 = arith.constant 0.000000e+00 : f32
    %cst_36 = arith.constant 2.550000e+02 : f32
    %66 = vector.broadcast %cst_35 : f32 to vector<16x16xf32>
    %67 = arith.maximumf %66, %65 : vector<16x16xf32>
    %68 = vector.broadcast %cst_36 : f32 to vector<16x16xf32>
    %69 = arith.minimumf %68, %67 : vector<16x16xf32>
    %cst_37 = arith.constant 0.0142200654 : f32
    %70 = vector.broadcast %cst_37 : f32 to vector<16x16xf32>
    %71 = arith.mulf %69, %70 : vector<16x16xf32>
    %cst_38 = arith.constant 1.48021972 : f32
    %72 = vector.broadcast %cst_38 : f32 to vector<16x16xf32>
    %73 = arith.subf %71, %72 : vector<16x16xf32>
    %c0_39 = arith.constant 0 : index
    %c2 = arith.constant 2 : index
    %c0_40 = arith.constant 0 : index
    %c0_41 = arith.constant 0 : index
    %74 = vector.load %arg6[%c0_39, %c2, %c0_40, %c0_41] : memref<1x3x16x16xf32, #tpu.memory_space<vmem>>, vector<1x1x16x16xf32>
    %75 = vector.shape_cast %74 : vector<1x1x16x16xf32> to vector<16x16xf32>
    %76 = vector.shape_cast %73 : vector<16x16xf32> to vector<1x1x16x16xf32>
    tpu.vector_store %arg6[%c0_39, %c2, %c0_40, %c0_41], %76 {strides = array<i32>} : memref<1x3x16x16xf32, #tpu.memory_space<vmem>>, vector<1x1x16x16xf32>,
    return
  }
  func.func @transform_0(%arg0: i32) -> (i32, i32) {
    %c0_i32 = arith.constant 0 : i32
    %c0_i32_0 = arith.constant 0 : i32
    %c0_i32_1 = arith.constant 0 : i32
    return %c0_i32, %c0_i32_0 : i32, i32
  }
  func.func @transform_1(%arg0: i32) -> (i32, i32) {
    %c0_i32 = arith.constant 0 : i32
    %c0_i32_0 = arith.constant 0 : i32
    %c0_i32_1 = arith.constant 0 : i32
    return %c0_i32, %c0_i32_0 : i32, i32
  }
  func.func @transform_2(%arg0: i32) -> (i32, i32) {
    %c0_i32 = arith.constant 0 : i32
    %c0_i32_0 = arith.constant 0 : i32
    %c0_i32_1 = arith.constant 0 : i32
    return %c0_i32, %c0_i32_0 : i32, i32
  }
  func.func @transform_3(%arg0: i32) -> (i32, i32) {
    %c0_i32 = arith.constant 0 : i32
    %c0_i32_0 = arith.constant 0 : i32
    %c0_i32_1 = arith.constant 0 : i32
    return %c0_i32, %c0_i32_0 : i32, i32
  }
  func.func @transform_4(%arg0: i32) -> (i32, i32, i32) {
    %c0_i32 = arith.constant 0 : i32
    %c0_i32_0 = arith.constant 0 : i32
    %c0_i32_1 = arith.constant 0 : i32
    return %arg0, %c0_i32, %c0_i32_0 : i32, i32, i32
  }
  func.func @transform_5(%arg0: i32) -> (i32, i32, i32, i32) {
    %c0_i32 = arith.constant 0 : i32
    %c0_i32_0 = arith.constant 0 : i32
    %c0_i32_1 = arith.constant 0 : i32
    %c0_i32_2 = arith.constant 0 : i32
    return %arg0, %c0_i32, %c0_i32_0, %c0_i32_1 : i32, i32, i32, i32
  }
}

</mosaic_0001>

<bundles_post_ra>
// kernel: tpu_custom_call.1
= control target key start
LH: loop header
LB: loop body
LE: loop exit
PB: predicated region body
PF: predicated region fallthrough
CT: control target
= control target key end

     0   :  { %10 = vsyncpa [#allocation3], 0  ;;  %s1151_s0 = inlined_call_operand.vmem [shape: bf16[16,24], index: 0, kind: input, shape index: {}]   ;;  %s1152_s1 = inlined_call_operand.vmem [shape: bf16[16,24], index: 1, kind: input, shape index: {}]   ;;  %s1153_s2 = inlined_call_operand.vmem [shape: bf16[20,16], index: 2, kind: input, shape index: {}]   ;;  %s1154_s3 = inlined_call_operand.vmem [shape: bf16[20,16], index: 3, kind: input, shape index: {}]   ;;  %s1155_s4 = inlined_call_operand.vmem [shape: u8[2,72,20], index: 4, kind: input, shape index: {}]   ;;  %s1156_s5 = inlined_call_operand.hbm [shape: f32[2,3,16,16], index: 5, kind: output, shape index: {}]  }
   0x1   :  { %12 = vsyncpa [#allocation3 + $0x1], 0  ;;  %s991_s18 = smov 0   ;;  %s993_s19 = smov 0  }
   0x2   :  { %s995_s20 = smov 0   ;;  %s997_s21 = smov 0  }
   0x3 LB: > { %s1012_s22 = sadd.s32 4294967295, %s957_s21   ;;  %s727_s23 = sadd.s32 4294967294, %s957_s21   ;;  %s957_s21 = sphi %s997_s21, %s1162_s21   ;;  %s953_s20 = sphi %s995_s20, %s1161_s20   ;;  %s949_s19 = sphi %s993_s19, %s1160_s19   ;;  %s945_s18 = sphi %s991_s18, %s1159_s18  }
   0x4   : > { %s1016_s24 = sadd.s32 1, %s957_s21   ;;  %s135_s25 = sadd.s32 1, %s953_s20 }
   0x5   : > { %s132_s26 = ssub.s32 %s957_s21, %s1016_s24  ;;  %p145_p0 = scmp.ne.s32.totalorder %s953_s20, %s949_s19 }
   0x6   : > { %p133_p1 = scmp.eq.s32.totalorder %s132_s26, 0  ;;  %p146_p2 = scmp.eq.s32.totalorder %s1012_s22, 1 }
   0x7   : > { %p151_p3 = scmp.ne.s32.totalorder %s949_s19, %s945_s18  ;;  %p152_p4 = scmp.eq.s32.totalorder %s727_s23, 1 }
   0x8   : > { %s1027_s27 = scalar_select %p133_p1, %s953_s20, %s135_s25  }
   0x9   : > { %p1029_p5 = por %p146_p2, %p145_p0  ;;  %p1033_p6 = por %p152_p4, %p151_p3 }
   0xa   : > { %p730_p7 = scmp.ge.s32.totalorder %s957_s21, 1  ;;  %p190_p8 = scmp.lt.s32.totalorder %s957_s21, 3 }
   0xc   : > { %p191_p9 = pnand %p730_p7, %p190_p8 }
   0xd   : > { %p218_p10 = scmp.lt.s32.totalorder (!%p191_p9), %s1012_s22, 1  ;;  %s215_s6 = sand.u32 (!%p191_p9), 1, %s949_s19  }
   0xe   : > { %194 = sbr.rel (%p191_p9) target bundleno = 420 (0x1a4), region = 40  ;;  %s915_s25 = scalar_lea.hbm (!%p191_p9), %s1156_s5, 96 }
   0xf   : > { %s803_s7 = smul.u32 (!%p191_p9), 48, %s215_s6 }
  0x11   : > { %s1103_s8 = scalar_lea.vmem (!%p191_p9), [#allocation2], %s803_s7 }
  0x12   : > { %s662_s13 = sshll.u32 (!%p191_p9), %s1103_s8, 4  ;;  %s663_s13 = int_to_ptr.vmem [resolvable:$true] %s662_s13 }
  0x13   : > { %v270_v0 = vld [vmem:[%s1154_s3 + $0x8] sm:$0x3]  ;;  %vm296_vm0 = vcmask 1041408   ;;  %s219_s9 = scalar_select %p218_p10, %s1012_s22, 1  ;;  %v781_v8 = vld [vmem:[%s1154_s3] sm:$0xff]  ;;  %vm280_vm1 = vcmask 162816  }
  0x14   : > { %v267_v1 = vld [vmem:[%s1153_s2 + $0x8] sm:$0x3]  ;;  %v276_v2 = vunpack.c.l.b16 %v270_v0  ;;  %v780_v9 = vld [vmem:[%s1153_s2] sm:$0xff]  ;;  %vm402_vm2 = vcmask 1043456   ;;  %vm398_vm3 = vcmask 195584   ;;  %vm480_vm5 = vcmask 130048  }
  0x15   : > { %v338_v3 = vunpack.c.l.b16 %v267_v1  ;;  %s804_s10 = smul.u32 18, %s219_s9 }
  0x16   : > { %v278_v4 = vpack.c.b16 %v276_v2, %v276_v2  ;;  %s853_s9 = smul.u32 48, %s1012_s22  ;;  %s650_s22 = scalar_lea.sflag [#allocation3], %s215_s6 }
  0x17   : > { %v340_v5 = vpack.c.b16 %v338_v3, %v338_v3  ;;  %s1056_s17 = scalar_lea.vmem %s1155_s4, %s804_s10 }
  0x18   : > { %v298_v6 = vsel %vm296_vm0, %v278_v4, 0  ;;  %v785_v10 = vld [vmem:[%s1056_s17] sm:$0xff]   ;;  %v801_v25 = vld [vmem:[%s1056_s17 + $0x8] sm:$0xff]   ;;  %v232_v40 = vld [vmem:[%s1056_s17 + $0x10] sm:$0x3]  ;;  %s661_s12 = scalar_lea.hbm %s1156_s5, %s853_s9 }
  0x19   : > { %v343_v7 = vsel %vm296_vm0, %v340_v5, 0  ;;  %306 = vmatpush.bf16.msra.mxu0 %v298_v6  ;;  %v786_v11 = vunpack.c.0.s8 %v785_v10  ;;  %v787_v12 = vunpack.c.1.s8 %v785_v10  ;;  %v790_v18 = vunpack.c.2.s8 %v785_v10  ;;  %s664_s14 = sshll.u32 %s661_s12, 4  ;;  %s665_s14 = int_to_ptr.hbm [resolvable:$true] %s664_s14 }
  0x1a   : > { %351 = vmatpush.bf16.msra.mxu1 %v343_v7  ;;  %v791_v19 = vunpack.c.3.s8 %v785_v10  ;;  %v794_v26 = vunpack.c.0.s8 %v801_v25  ;;  %v795_v27 = vunpack.c.1.s8 %v801_v25  ;;  %v798_v33 = vunpack.c.2.s8 %v801_v25  ;;  %s909_s15 = sshra.s32 %s665_s14, 4  ;;  %s910_s15 = int_to_ptr.hbm [resolvable:$true] %s909_s15 }
  0x1b   : > { %v242_v13 = vand.u32 255, %v786_v11  ;;  %v243_v14 = vand.u32 255, %v787_v12  ;;  %v244_v20 = vand.u32 255, %v790_v18  ;;  %v799_v34 = vunpack.c.3.s8 %v801_v25  ;;  %s911_s16 = scalar_lea.hbm %s910_s15, 48  ;;  %p916_p0 = scmp.lt.s32.totalorder %s910_s15, %s1156_s5 }
  0x1c   : > { %v245_v21 = vand.u32 255, %v791_v19  ;;  %v246_v28 = vand.u32 255, %v794_v26  ;;  %v247_v29 = vand.u32 255, %v795_v27  ;;  %v248_v35 = vand.u32 255, %v798_v33  ;;  %v783_v26 = vld [vmem:[%s1152_s1] sm:$0xff]  ;;  %p912_p11 = scmp.ne.s32.totalorder %s910_s15, %s911_s16  ;;  %p917_p1 = scmp.lt.s32.totalorder %s915_s25, %s911_s16 }
  0x1d   : > { %307 = vmatpush.bf16.msra.mxu0 %v781_v8  ;;  %v251_v15 = vcvt.s32.f32 %v242_v13  ;;  %v252_v16 = vcvt.s32.f32 %v243_v14  ;;  %v253_v22 = vcvt.s32.f32 %v244_v20  ;;  %v249_v36 = vand.u32 255, %v799_v34 }
  0x1e   : > { %352 = vmatpush.bf16.msra.mxu1 %v780_v9  ;;  %v254_v23 = vcvt.s32.f32 %v245_v21  ;;  %v255_v30 = vcvt.s32.f32 %v246_v28  ;;  %v256_v31 = vcvt.s32.f32 %v247_v29  ;;  %v257_v37 = vcvt.s32.f32 %v248_v35  ;;  %v1076_v9 = vld [vmem:[%s1151_s0] sm:$0xff]  ;;  %p913_p12 = pnand %p912_p11, %p1029_p5  ;;  %p918_p2 = por %p917_p1, %p916_p0 }
  0x1f   : > { %v260_v17 = vpack.c.bf16 %v252_v16, %v251_v15  ;;  %v258_v38 = vcvt.s32.f32 %v249_v36  ;;  %v241_v41 = vunpack.c.0.s8 %v232_v40 }
  0x20   : > { %v261_v24 = vpack.c.bf16 %v254_v23, %v253_v22  ;;  %v262_v32 = vpack.c.bf16 %v256_v31, %v255_v30  ;;  %p914_p13 = pneg %p913_p12 }
  0x21   : > { %736 = vmatmul.msk.bf16.vlgmr.msra.gmra.mxu0 %vm280_vm1, %v260_v17  ;;  %745 = vmatmul.msk.bf16.vlgmr.msra.gmra.mxu1 %vm280_vm1, %v260_v17  ;;  %v263_v39 = vpack.c.bf16 %v258_v38, %v257_v37  ;;  %v250_v42 = vand.u32 255, %v241_v41 }
  0x22   : > { %p919_p3 = pnand %p918_p2, %p914_p13 }
  0x23   : > { %v259_v43 = vcvt.s32.f32 %v250_v42 }
  0x25   : > { %v264_v44 = vpack.c.bf16 %v259_v43, %v259_v43 }
  0x31   : > { %737 = vmatmul.msk.bf16.gmra.mxu0 %vm280_vm1, %v261_v24  ;;  %746 = vmatmul.msk.bf16.gmra.mxu1 %vm280_vm1, %v261_v24 }
  0x41   : > { %738 = vmatmul.msk.bf16.gmra.mxu0 %vm280_vm1, %v262_v32  ;;  %747 = vmatmul.msk.bf16.gmra.mxu1 %vm280_vm1, %v262_v32 }
  0x51   : > { %739 = vmatmul.msk.bf16.gmra.mxu0 %vm280_vm1, %v263_v39  ;;  %748 = vmatmul.msk.bf16.gmra.mxu1 %vm280_vm1, %v263_v39 }
  0x61   : > { %740 = vmatmul.msk.bf16.gmra.mxu0 %vm280_vm1, %v264_v44  ;;  %749 = vmatmul.msk.bf16.gmra.mxu1 %vm280_vm1, %v264_v44 }
  0x9e   : > { %v309_v45 = vpop.f32.mrf.mxu0  ;;  %v354_v46 = vpop.f32.mrf.mxu1 }
  0x9f   : > { %v355_v50 = vadd.f32 %v354_v46, %v309_v45 }
  0xa1   : > { %v382_v56 = vpack.c.bf16 %v355_v50, %v355_v50 }
  0xa3   : > { %v385_v62 = vunpack.c.l.bf16 %v382_v56  ;;  %v423_v5 = vunpack.c.l.b16 %v382_v56 }
  0xa5   : > { %v388_v7 = vsub.f32 %v355_v50, %v385_v62 }
  0xa6   : > { %v311_v47 = vpop.f32.mrf.mxu0  ;;  %v356_v48 = vpop.f32.mrf.mxu1 }
  0xa7   : > { %v357_v49 = vadd.f32 %v356_v48, %v311_v47 }
  0xa9   : > { %v383_v54 = vpack.c.bf16 %v357_v49, %v357_v49 }
  0xab   : > { %v386_v59 = vunpack.c.l.bf16 %v383_v54  ;;  %v424_v1 = vunpack.c.l.b16 %v383_v54 }
  0xad   : > { %v389_v4 = vsub.f32 %v357_v49, %v386_v59  ;;  %v426_v8 = vpack.c.b16 %v424_v1, %v423_v5 }
  0xae   : > { %v314_v51 = vpop.f32.mrf.mxu0  ;;  %v359_v52 = vpop.f32.mrf.mxu1 }
  0xaf   : > { %v360_v53 = vadd.f32 %v359_v52, %v314_v51  ;;  %v391_v10 = vpack.c.bf16 %v389_v4, %v388_v7 }
  0xb1   : > { %v384_v55 = vpack.c.bf16 %v360_v53, %v360_v53 }
  0xb3   : > { %v425_v57 = vunpack.c.l.b16 %v384_v55  ;;  %v387_v58 = vunpack.c.l.bf16 %v384_v55 }
  0xb5   : > { %v427_v60 = vpack.c.b16 %v425_v57, %v425_v57  ;;  %v390_v61 = vsub.f32 %v360_v53, %v387_v58 }
  0xb6   : > { %v316_v63 = vpop.f32.mrf.mxu0  ;;  %v361_v0 = vpop.f32.mrf.mxu1 }
  0xb7   : > { %v430_v2 = vsel %vm402_vm2, %v427_v60, 0  ;;  %v392_v3 = vpack.c.bf16 %v390_v61, %v390_v61  ;;  %v362_v14 = vadd.f32 %v361_v0, %v316_v63 }
  0xb8   : > { %438 = vmatpush.bf16.msra.mxu3 %v430_v2 }
  0xb9   : > { %v404_v6 = vsel %vm402_vm2, %v392_v3, 0  ;;  %v483_v20 = vpack.c.bf16 %v362_v14, %v362_v14 }
  0xba   : > { %412 = vmatpush.bf16.msra.mxu2 %v404_v6 }
  0xbb   : > { %v486_v27 = vunpack.c.l.bf16 %v483_v20  ;;  %v514_v33 = vunpack.c.l.b16 %v483_v20 }
  0xbc   : > { %439 = vmatpush.bf16.msra.mxu3 %v426_v8 }
  0xbd   : > { %v489_v36 = vsub.f32 %v362_v14, %v486_v27 }
  0xbe   : > { %v319_v11 = vpop.f32.mrf.mxu0  ;;  %v364_v12 = vpop.f32.mrf.mxu1  ;;  %413 = vmatpush.bf16.msra.mxu2 %v391_v10 }
  0xbf   : > { %755 = vmatmul.msk.bf16.vlgmr.msra.gmra.mxu3 %vm398_vm3, %v1076_v9  ;;  %v365_v13 = vadd.f32 %v364_v12, %v319_v11 }
  0xc1   : > { %754 = vmatmul.msk.bf16.vlgmr.msra.gmra.mxu2 %vm398_vm3, %v1076_v9  ;;  %v484_v18 = vpack.c.bf16 %v365_v13, %v365_v13 }
  0xc2   : > { %460 = vmatpush.bf16.msrb.mxu2 %v430_v2 }
  0xc3   : > { %v487_v23 = vunpack.c.l.bf16 %v484_v18  ;;  %v515_v28 = vunpack.c.l.b16 %v484_v18 }
  0xc5   : > { %v490_v34 = vsub.f32 %v365_v13, %v487_v23  ;;  %v517_v37 = vpack.c.b16 %v515_v28, %v514_v33 }
  0xc6   : > { %461 = vmatpush.bf16.msrb.mxu2 %v426_v8  ;;  %v321_v15 = vpop.f32.mrf.mxu0  ;;  %v366_v16 = vpop.f32.mrf.mxu1 }
  0xc7   : > { %v367_v17 = vadd.f32 %v366_v16, %v321_v15  ;;  %v492_v38 = vpack.c.bf16 %v490_v34, %v489_v36 }
  0xc9   : > { %v485_v19 = vpack.c.bf16 %v367_v17, %v367_v17 }
  0xcb   : > { %v488_v21 = vunpack.c.l.bf16 %v485_v19  ;;  %v516_v22 = vunpack.c.l.b16 %v485_v19 }
  0xcd   : > { %v491_v24 = vsub.f32 %v367_v17, %v488_v21  ;;  %v518_v25 = vpack.c.b16 %v516_v22, %v516_v22 }
  0xce   : > { %v324_v29 = vpop.f32.mrf.mxu0  ;;  %v369_v30 = vpop.f32.mrf.mxu1 }
  0xcf   : > { %v521_v31 = vsel %vm402_vm2, %v518_v25, 0  ;;  %v493_v32 = vpack.c.bf16 %v491_v24, %v491_v24  ;;  %v370_v42 = vadd.f32 %v369_v30, %v324_v29 }
  0xd0   : > { %529 = vmatpush.bf16.msra.mxu2 %v521_v31 }
  0xd1   : > { %760 = vmatmul.msk.bf16.vlgmr.msrb.gmra.mxu2 %vm398_vm3, %v783_v26  ;;  %v495_v35 = vsel %vm402_vm2, %v493_v32, 0  ;;  %v566_v48 = vpack.c.bf16 %v370_v42, %v370_v42 }
  0xd2   : > { %503 = vmatpush.bf16.msrb.mxu3 %v495_v35 }
  0xd3   : > { %v569_v54 = vunpack.c.l.bf16 %v566_v48  ;;  %v597_v60 = vunpack.c.l.b16 %v566_v48 }
  0xd4   : > { %530 = vmatpush.bf16.msra.mxu2 %v517_v37 }
  0xd5   : > { %v572_v63 = vsub.f32 %v370_v42, %v569_v54 }
  0xd6   : > { %v326_v39 = vpop.f32.mrf.mxu0  ;;  %v371_v40 = vpop.f32.mrf.mxu1  ;;  %504 = vmatpush.bf16.msrb.mxu3 %v492_v38 }
  0xd7   : > { %v372_v41 = vadd.f32 %v371_v40, %v326_v39 }
  0xd9   : > { %763 = vmatmul.msk.bf16.vlgmr.msrb.gmra.mxu3 %vm398_vm3, %v1076_v9  ;;  %v567_v46 = vpack.c.bf16 %v372_v41, %v372_v41 }
  0xda   : > { %543 = vmatpush.bf16.msra.mxu3 %v521_v31 }
  0xdb   : > { %v570_v51 = vunpack.c.l.bf16 %v567_v46  ;;  %v598_v55 = vunpack.c.l.b16 %v567_v46 }
  0xdd   : > { %v573_v61 = vsub.f32 %v372_v41, %v570_v51  ;;  %v600_v0 = vpack.c.b16 %v598_v55, %v597_v60 }
  0xde   : > { %544 = vmatpush.bf16.msra.mxu3 %v517_v37  ;;  %v329_v43 = vpop.f32.mrf.mxu0  ;;  %v374_v44 = vpop.f32.mrf.mxu1 }
  0xdf   : > { %v375_v45 = vadd.f32 %v374_v44, %v329_v43  ;;  %v575_v1 = vpack.c.bf16 %v573_v61, %v572_v63 }
  0xe1   : > { %v568_v47 = vpack.c.bf16 %v375_v45, %v375_v45  ;;  %764 = vmatmul.msk.bf16.vlgmr.msra.gmra.mxu2 %vm398_vm3, %v1076_v9 }
  0xe3   : > { %v571_v49 = vunpack.c.l.bf16 %v568_v47  ;;  %v599_v50 = vunpack.c.l.b16 %v568_v47 }
  0xe5   : > { %v574_v52 = vsub.f32 %v375_v45, %v571_v49  ;;  %v601_v53 = vpack.c.b16 %v599_v50, %v599_v50 }
  0xe6   : > { %v331_v56 = vpop.f32.mrf.mxu0  ;;  %v376_v57 = vpop.f32.mrf.mxu1 }
  0xe7   : > { %v576_v58 = vpack.c.bf16 %v574_v52, %v574_v52  ;;  %v604_v59 = vsel %vm402_vm2, %v601_v53, 0 }
  0xe8   : > { %612 = vmatpush.bf16.msrb.mxu3 %v604_v59 }
  0xe9   : > { %765 = vmatmul.msk.bf16.vlgmr.msra.gmra.mxu3 %vm398_vm3, %v783_v26  ;;  %v578_v62 = vsel %vm402_vm2, %v576_v58, 0 }
  0xea   : > { %586 = vmatpush.bf16.msrb.mxu2 %v578_v62 }
  0xec   : > { %613 = vmatpush.bf16.msrb.mxu3 %v600_v0 }
  0xee   : > { %587 = vmatpush.bf16.msrb.mxu2 %v575_v1 }
  0xf1   : > { %770 = vmatmul.msk.bf16.vlgmr.msrb.gmra.mxu2 %vm398_vm3, %v1076_v9 }
  0xf2   : > { %626 = vmatpush.bf16.msra.mxu2 %v604_v59 }
  0xf6   : > { %627 = vmatpush.bf16.msra.mxu2 %v600_v0 }
  0xf9   : > { %771 = vmatmul.msk.bf16.vlgmr.msrb.gmra.mxu3 %vm398_vm3, %v1076_v9 }
 0x101   : > { %772 = vmatmul.msk.bf16.vlgmr.msra.gmra.mxu2 %vm398_vm3, %v783_v26 }
 0x142   : > { %v441_v3 = vpop.f32.mrf.mxu3 }
 0x144   : > { %v415_v2 = vpop.f32.mrf.mxu2 }
 0x145   : > { %v442_v5 = vadd.f32 %v441_v3, %v415_v2 }
 0x14a   : > { %v443_v6 = vpop.f32.mrf.mxu3 }
 0x14c   : > { %v417_v4 = vpop.f32.mrf.mxu2 }
 0x14d   : > { %v444_v13 = vadd.f32 %v443_v6, %v417_v4 }
 0x154   : > { %v463_v7 = vpop.f32.mrf.mxu2 }
 0x155   : > { %v468_v8 = vadd.f32 %v463_v7, %v442_v5 }
 0x157   : > { %v807_v10 = vcvt.f32.s32 %v468_v8  ;;  %v805_v12 = vand.u32 2147483647, %v468_v8  ;;  %v810_v15 = vand.u32 2147483648, %v468_v8 }
 0x159   : > { %v808_v11 = vcvt.s32.f32 %v807_v10  ;;  %vm806_vm4 = vcmp.lt.f32.partialorder %v805_v12, 8388608.0 }
 0x15b   : > { %v809_v14 = vand.u32 2147483647, %v808_v11 }
 0x15c   : > { %v465_v16 = vpop.f32.mrf.mxu2  ;;  %v506_v17 = vpop.f32.mrf.mxu3 }
 0x15d   : > { %v811_v9 = vor.u32 %v810_v15, %v809_v14  ;;  %v469_v18 = vadd.f32 %v465_v16, %v444_v13 }
 0x15f   : > { %v812_v19 = vsel %vm806_vm4, %v811_v9, %v468_v8  ;;  %v815_v20 = vcvt.f32.s32 %v469_v18  ;;  %v813_v24 = vand.u32 2147483647, %v469_v18  ;;  %v818_v26 = vand.u32 2147483648, %v469_v18 }
 0x160   : > { %v472_v21 = vmax.f32 %v812_v19, 0.0 }
 0x161   : > { %v816_v22 = vcvt.s32.f32 %v815_v20  ;;  %vm814_vm6 = vcmp.lt.f32.partialorder %v813_v24, 8388608.0 }
 0x162   : > { %v474_v23 = vmin.f32 %v472_v21, 255.0 }
 0x163   : > { %v817_v25 = vand.u32 2147483647, %v816_v22 }
 0x164   : > { %v476_v27 = vmul.f32 0.014598426, %v474_v23  ;;  %v508_v28 = vpop.f32.mrf.mxu3  ;;  %v532_v29 = vpop.f32.mrf.mxu2 }
 0x165   : > { %v819_v30 = vor.u32 %v818_v26, %v817_v25  ;;  %v533_v35 = vadd.f32 %v532_v29, %v506_v17 }
 0x166   : > { %v761_v31 = vadd.f32 -1.7922626, %v476_v27 }
 0x167   : > { %v820_v32 = vsel %vm814_vm6, %v819_v30, %v469_v18 }
 0x168   : > { %481 = vst.msk [vmem:[%s1103_s8] sm:$0xff] %vm480_vm5, %v761_v31  ;;  %v473_v33 = vmax.f32 %v820_v32, 0.0 }
 0x16a   : > { %v475_v34 = vmin.f32 %v473_v33, 255.0 }
 0x16c   : > { %v477_v36 = vmul.f32 0.014598426, %v475_v34  ;;  %v534_v37 = vpop.f32.mrf.mxu2  ;;  %v546_v38 = vpop.f32.mrf.mxu3 }
 0x16d   : > { %v551_v39 = vadd.f32 %v546_v38, %v533_v35  ;;  %v535_v44 = vadd.f32 %v534_v37, %v508_v28 }
 0x16e   : > { %v762_v40 = vadd.f32 -1.7922626, %v477_v36 }
 0x16f   : > { %v823_v41 = vcvt.f32.s32 %v551_v39  ;;  %v821_v43 = vand.u32 2147483647, %v551_v39  ;;  %v826_v46 = vand.u32 2147483648, %v551_v39 }
 0x170   : > { %482 = vst.msk [vmem:[%s1103_s8 + $0x8] sm:$0xff] %vm480_vm5, %v762_v40 }
 0x171   : > { %v824_v42 = vcvt.s32.f32 %v823_v41  ;;  %vm822_vm7 = vcmp.lt.f32.partialorder %v821_v43, 8388608.0 }
 0x173   : > { %v825_v45 = vand.u32 2147483647, %v824_v42 }
 0x174   : > { %v548_v47 = vpop.f32.mrf.mxu3  ;;  %v589_v48 = vpop.f32.mrf.mxu2 }
 0x175   : > { %v827_v49 = vor.u32 %v826_v46, %v825_v45  ;;  %v552_v50 = vadd.f32 %v548_v47, %v535_v44 }
 0x177   : > { %v828_v51 = vsel %vm822_vm7, %v827_v49, %v551_v39  ;;  %v831_v52 = vcvt.f32.s32 %v552_v50  ;;  %v829_v56 = vand.u32 2147483647, %v552_v50  ;;  %v834_v58 = vand.u32 2147483648, %v552_v50 }
 0x178   : > { %v555_v53 = vmax.f32 %v828_v51, 0.0 }
 0x179   : > { %v832_v54 = vcvt.s32.f32 %v831_v52  ;;  %vm830_vm8 = vcmp.lt.f32.partialorder %v829_v56, 8388608.0 }
 0x17a   : > { %v557_v55 = vmin.f32 %v555_v53, 255.0 }
 0x17b   : > { %v833_v57 = vand.u32 2147483647, %v832_v54 }
 0x17c   : > { %v559_v59 = vmul.f32 0.015007769, %v557_v55  ;;  %v591_v60 = vpop.f32.mrf.mxu2  ;;  %v615_v63 = vpop.f32.mrf.mxu3 }
 0x17d   : > { %v835_v61 = vor.u32 %v834_v58, %v833_v57  ;;  %v616_v3 = vadd.f32 %v615_v63, %v589_v48 }
 0x17e   : > { %v766_v62 = vadd.f32 -1.7520971, %v559_v59 }
 0x17f   : > { %v836_v0 = vsel %vm830_vm8, %v835_v61, %v552_v50 }
 0x180   : > { %768 = vst.msk [vmem:[%s1103_s8 + $0x10] sm:$0xff] %vm480_vm5, %v766_v62  ;;  %v556_v1 = vmax.f32 %v836_v0, 0.0 }
 0x182   : > { %v558_v2 = vmin.f32 %v556_v1, 255.0 }
 0x184   : > { %v560_v4 = vmul.f32 0.015007769, %v558_v2  ;;  %v629_v5 = vpop.f32.mrf.mxu2  ;;  %v617_v10 = vpop.f32.mrf.mxu3 }
 0x185   : > { %v634_v6 = vadd.f32 %v629_v5, %v616_v3  ;;  %v618_v13 = vadd.f32 %v617_v10, %v591_v60 }
 0x186   : > { %v767_v7 = vadd.f32 -1.7520971, %v560_v4 }
 0x187   : > { %v839_v8 = vcvt.f32.s32 %v634_v6  ;;  %v837_v12 = vand.u32 2147483647, %v634_v6  ;;  %v842_v15 = vand.u32 2147483648, %v634_v6 }
 0x188   : > { %769 = vst.msk [vmem:[%s1103_s8 + $0x18] sm:$0xff] %vm480_vm5, %v767_v7 }
 0x189   : > { %v840_v11 = vcvt.s32.f32 %v839_v8  ;;  %vm838_vm9 = vcmp.lt.f32.partialorder %v837_v12, 8388608.0 }
 0x18b   : > { %v841_v14 = vand.u32 2147483647, %v840_v11 }
 0x18c   : > { %v631_v16 = vpop.f32.mrf.mxu2 }
 0x18d   : > { %v843_v17 = vor.u32 %v842_v15, %v841_v14  ;;  %v635_v9 = vadd.f32 %v631_v16, %v618_v13 }
 0x18f   : > { %v844_v18 = vsel %vm838_vm9, %v843_v17, %v634_v6  ;;  %v847_v19 = vcvt.f32.s32 %v635_v9  ;;  %v845_v23 = vand.u32 2147483647, %v635_v9  ;;  %v850_v25 = vand.u32 2147483648, %v635_v9 }
 0x190   : > { %v638_v20 = vmax.f32 %v844_v18, 0.0 }
 0x191   : > { %v848_v21 = vcvt.s32.f32 %v847_v19  ;;  %vm846_vm10 = vcmp.lt.f32.partialorder %v845_v23, 8388608.0 }
 0x192   : > { %v640_v22 = vmin.f32 %v638_v20, 255.0 }
 0x193   : > { %v849_v24 = vand.u32 2147483647, %v848_v21 }
 0x194   : > { %v642_v26 = vmul.f32 0.014220065, %v640_v22 }
 0x195   : > { %v851_v27 = vor.u32 %v850_v25, %v849_v24 }
 0x196   : > { %v773_v28 = vadd.f32 -1.4802197, %v642_v26 }
 0x197   : > { %v852_v29 = vsel %vm846_vm10, %v851_v27, %v635_v9 }
 0x198   : > { %775 = vst.msk [vmem:[%s1103_s8 + $0x20] sm:$0xff] %vm480_vm5, %v773_v28  ;;  %v639_v30 = vmax.f32 %v852_v29, 0.0 }
 0x19a   : > { %v641_v31 = vmin.f32 %v639_v30, 255.0 }
 0x19c   : > { %v643_v32 = vmul.f32 0.014220065, %v641_v31 }
 0x19e   : > { %v774_v33 = vadd.f32 -1.4802197, %v643_v32 }
 0x1a0   : > { %776 = vst.msk [vmem:[%s1103_s8 + $0x28] sm:$0xff] %vm480_vm5, %v774_v33 }
 0x1a1   : > { %922 = shalt.err (!%p919_p3)
}
 0x1a2   : > { %s959_s6 = smov 128   ;;  %s960_s7 = smov 8  }
 0x1a3   : > { %854 = dma.vmem_to_hbm [thread:$0]  (%p1029_p5), %s663_s13, 768, %s665_s14, %s650_s22, %s959_s6, %s959_s6, %s960_s7  }
 0x1a4 PF: > { %p860_p4 = scmp.ge.s32.totalorder %s957_s21, 2  ;;  %s679_s8 = sand.u32 1, %s945_s18  }
 0x1a5   : > { %s680_s9 = scalar_lea.sflag [#allocation3], %s679_s8 }
 0x1a6   : > { %p857_p7 = pnand %p860_p4, %p1033_p6 }
 0x1a8   : > { %p858_p8 = pneg %p857_p7 }
 0x1aa   : > { %940 = dma.done.wait (%p858_p8), %s680_s9, 768  }
 0x1ab   : > { %942 = vsyncadd (%p858_p8), %s680_s9, 4294966528  ;;  %p15_p9 = scmp.ge.s32.totalorder %s1016_s24, 4   ;;  %s1159_s18 = smov %s949_s19 }
 0x1ac   : > { %s1160_s19 = smov %s953_s20  ;;  %s1161_s20 = smov %s1027_s27 }
 0x1ad   : > { %s1162_s21 = smov %s1016_s24  ;;  %17 = sbr.rel (!%p15_p9) target bundleno = 3 (0x3), region = 77 }
 0x1b2   :  { %686 = vsyncpa [#allocation3], 1 }
 0x1b3   :  { %688 = vsyncpa [#allocation3 + $0x1], 1 }

</bundles_post_ra>
